<compile_context>
chip_gen: v7x
topology: tpu7x:2x2x1
jax: 0.10.0
libtpu: 0.0.40
codegen_flags: <defaults>
</compile_context>

<pallas_src>
import jax
import jax.numpy as jnp
from jax import lax
from jax.experimental import pallas as pl
from jax.experimental.pallas import tpu as pltpu

LEAKY_SLOPE = 0.01  # PyTorch nn.LeakyReLU default negative_slope


def _leaky_relu(v):
    return jnp.where(v > 0, v, LEAKY_SLOPE * v)


def _round_up(x, m):
    return (x + m - 1) // m * m


def qnetwork_kernel(s_ref, a_ref,
                    w1s_ref, w1a_ref, b1_ref,
                    w2_ref, b2_ref,
                    w3_ref, b3_ref,
                    w4t_ref, b4_ref,
                    o_ref):
    """One batch tile of the 4-layer MLP, fully fused (4 matmuls + LeakyReLU)."""
    s = s_ref[...].astype(jnp.bfloat16)   # (TILE_B, num_inputs)
    a = a_ref[...].astype(jnp.bfloat16)   # (TILE_B, num_actions)

    # Layer 1: split matmul == cat([s, a], 1) @ W1.
    h = (jnp.dot(s, w1s_ref[...], preferred_element_type=jnp.float32)
         + jnp.dot(a, w1a_ref[...], preferred_element_type=jnp.float32)
         + b1_ref[...])
    h = _leaky_relu(h)

    h = jnp.dot(h.astype(jnp.bfloat16), w2_ref[...],
                preferred_element_type=jnp.float32) + b2_ref[...]
    h = _leaky_relu(h)

    h = jnp.dot(h.astype(jnp.bfloat16), w3_ref[...],
                preferred_element_type=jnp.float32) + b3_ref[...]
    h = _leaky_relu(h)

    # Final layer computed transposed: (1, H) x (TILE_B, H)^T -> (1, TILE_B),
    # so the output store is lane-dense (batch on the 128-lane axis).
    out_t = lax.dot_general(
        w4t_ref[...], h.astype(jnp.bfloat16),
        dimension_numbers=(((1,), (1,)), ((), ())),
        preferred_element_type=jnp.float32)
    o_ref[...] = out_t + b4_ref[...]   # b4 already includes scalar q_bias


def qnetwork_forward(state, action, params, q_bias=0.0, tile_b=1024):
    """state: [B, num_inputs], action: [B, num_actions] -> [B, 1]."""
    batch = state.shape[0]
    num_inputs = state.shape[1]
    num_actions = action.shape[1]
    hidden = params["b1"].shape[1]

    # Batch tile: multiple of 128 (lane-dense output + sublane alignment).
    # Sized small enough to fit comfortably in v7x's 64 MiB VMEM even with
    # double-buffered input tiles.
    tile_b = min(tile_b, _round_up(max(batch, 1), 128))
    tile_b = _round_up(tile_b, 128)
    b_pad = _round_up(batch, tile_b)

    state = state.astype(jnp.float32)
    action = action.astype(jnp.float32)
    if b_pad != batch:
        state = jnp.pad(state, ((0, b_pad - batch), (0, 0)))
        action = jnp.pad(action, ((0, b_pad - batch), (0, 0)))

    # Fold the module-level scalar bias into the last-layer bias.
    b4_eff = (params["b4"] + jnp.float32(q_bias)).astype(jnp.float32)

    grid = (b_pad // tile_b,)

    def batch_spec(feat):
        return pl.BlockSpec((tile_b, feat), lambda i: (i, 0))

    def const_spec(shape):
        return pl.BlockSpec(shape, lambda i: (0, 0))  # VMEM-resident

    out_t = pl.pallas_call(
        qnetwork_kernel,
        out_shape=jax.ShapeDtypeStruct((1, b_pad), jnp.float32),
        grid=grid,
        in_specs=[
            batch_spec(num_inputs),            # state tile
            batch_spec(num_actions),           # action tile
            const_spec((num_inputs, hidden)),  # W1 (state rows)
            const_spec((num_actions, hidden)), # W1 (action rows)
            const_spec((1, hidden)),           # b1
            const_spec((hidden, hidden)),      # W2
            const_spec((1, hidden)),           # b2
            const_spec((hidden, hidden)),      # W3
            const_spec((1, hidden)),           # b3
            const_spec((1, hidden)),           # W4^T
            const_spec((1, 1)),                # b4 + q_bias
        ],
        out_specs=pl.BlockSpec((1, tile_b), lambda i: (0, i)),
        compiler_params=pltpu.CompilerParams(
            dimension_semantics=("parallel",)),
    )(state, action,
      params["w1s"], params["w1a"], params["b1"],
      params["w2"], params["b2"],
      params["w3"], params["b3"],
      params["w4t"], b4_eff)

    return out_t[0, :batch][:, None]   # -> (batch, 1)


def init_params(key, num_inputs, num_actions, hidden_size):
    """Mirror nn.Linear init U(-1/sqrt(fan_in), 1/sqrt(fan_in)).

    Weights stored as [in_features, out_features]; the first layer is split
    into state/action blocks; the last layer is stored transposed (1, H).
    Weights are bf16 (MXU-native), biases f32.
    """
    def uni(k, shape, bound):
        return jax.random.uniform(k, shape, jnp.float32, -bound, bound)

    k = jax.random.split(key, 9)
    bnd1 = float(num_inputs + num_actions) ** -0.5
    bndh = float(hidden_size) ** -0.5
    return {
        "w1s": uni(k[0], (num_inputs, hidden_size), bnd1).astype(jnp.bfloat16),
        "w1a": uni(k[1], (num_actions, hidden_size), bnd1).astype(jnp.bfloat16),
        "b1":  uni(k[2], (1, hidden_size), bnd1),
        "w2":  uni(k[3], (hidden_size, hidden_size), bndh).astype(jnp.bfloat16),
        "b2":  uni(k[4], (1, hidden_size), bndh),
        "w3":  uni(k[5], (hidden_size, hidden_size), bndh).astype(jnp.bfloat16),
        "b3":  uni(k[6], (1, hidden_size), bndh),
        "w4t": uni(k[7], (1, hidden_size), bndh).astype(jnp.bfloat16),
        "b4":  uni(k[8], (1, 1), bndh),
    }


def qnetwork_reference(state, action, params, q_bias=0.0):
    """Pure-JAX reference (same bf16-weight / f32-accumulate math)."""
    s = state.astype(jnp.bfloat16)
    a = action.astype(jnp.bfloat16)
    h = _leaky_relu(
        jnp.dot(s, params["w1s"], preferred_element_type=jnp.float32)
        + jnp.dot(a, params["w1a"], preferred_element_type=jnp.float32)
        + params["b1"])
    h = _leaky_relu(
        jnp.dot(h.astype(jnp.bfloat16), params["w2"],
                preferred_element_type=jnp.float32) + params["b2"])
    h = _leaky_relu(
        jnp.dot(h.astype(jnp.bfloat16), params["w3"],
                preferred_element_type=jnp.float32) + params["b3"])
    out = jnp.dot(h.astype(jnp.bfloat16), params["w4t"].T,
                  preferred_element_type=jnp.float32) + params["b4"]
    return out + jnp.float32(q_bias)


if __name__ == "__main__":
    num_inputs, num_actions, hidden_size, batch = 16, 8, 32, 8
    q_bias = 0.5

    key = jax.random.PRNGKey(0)
    key, ks, ka, kp = jax.random.split(key, 4)
    state = jax.random.normal(ks, (batch, num_inputs), jnp.float32)
    action = jax.random.normal(ka, (batch, num_actions), jnp.float32)
    params = init_params(kp, num_inputs, num_actions, hidden_size)

    out = qnetwork_forward(state, action, params, q_bias)
    out = jax.block_until_ready(out)

    ref = qnetwork_reference(state, action, params, q_bias)
    assert out.shape == (batch, 1), out.shape
    assert jnp.allclose(out, ref, atol=1e-3, rtol=1e-3), (out, ref)

    print("KERNEL_OK")
</pallas_src>

<mosaic_0001>
module attributes {stable_mosaic.version = 11 : i64} {
  func.func @qnetwork_kernel(%arg0: i32, %arg1: memref<128x16xf32, #tpu.memory_space<vmem>>, %arg2: memref<128x8xf32, #tpu.memory_space<vmem>>, %arg3: memref<16x32xbf16, #tpu.memory_space<vmem>>, %arg4: memref<8x32xbf16, #tpu.memory_space<vmem>>, %arg5: memref<1x32xf32, #tpu.memory_space<vmem>>, %arg6: memref<32x32xbf16, #tpu.memory_space<vmem>>, %arg7: memref<1x32xf32, #tpu.memory_space<vmem>>, %arg8: memref<32x32xbf16, #tpu.memory_space<vmem>>, %arg9: memref<1x32xf32, #tpu.memory_space<vmem>>, %arg10: memref<1x32xbf16, #tpu.memory_space<vmem>>, %arg11: memref<1x1xf32, #tpu.memory_space<vmem>>, %arg12: memref<1x128xf32, #tpu.memory_space<vmem>>) attributes {dimension_semantics = [#tpu.dimension_semantics<parallel>], iteration_bounds = array<i64: 1>, scalar_prefetch = 0 : i64, scratch_operands = 0 : i64, tpu.core_type = #tpu.core_type<tc>, window_params = [{transform_indices = @transform_0, window_bounds = array<i64: 128, 16>}, {transform_indices = @transform_1, window_bounds = array<i64: 128, 8>}, {pipeline_mode = #tpu.pipeline_mode<synchronous>, transform_indices = @transform_2, window_bounds = array<i64: 16, 32>}, {pipeline_mode = #tpu.pipeline_mode<synchronous>, transform_indices = @transform_3, window_bounds = array<i64: 8, 32>}, {pipeline_mode = #tpu.pipeline_mode<synchronous>, transform_indices = @transform_4, window_bounds = array<i64: 1, 32>}, {pipeline_mode = #tpu.pipeline_mode<synchronous>, transform_indices = @transform_5, window_bounds = array<i64: 32, 32>}, {pipeline_mode = #tpu.pipeline_mode<synchronous>, transform_indices = @transform_6, window_bounds = array<i64: 1, 32>}, {pipeline_mode = #tpu.pipeline_mode<synchronous>, transform_indices = @transform_7, window_bounds = array<i64: 32, 32>}, {pipeline_mode = #tpu.pipeline_mode<synchronous>, transform_indices = @transform_8, window_bounds = array<i64: 1, 32>}, {pipeline_mode = #tpu.pipeline_mode<synchronous>, transform_indices = @transform_9, window_bounds = array<i64: 1, 32>}, {pipeline_mode = #tpu.pipeline_mode<synchronous>, transform_indices = @transform_10, window_bounds = array<i64: 1, 1>}, {transform_indices = @transform_11, window_bounds = array<i64: 1, 128>}]} {
    %c0 = arith.constant 0 : index
    %c0_0 = arith.constant 0 : index
    %0 = vector.load %arg1[%c0, %c0_0] : memref<128x16xf32, #tpu.memory_space<vmem>>, vector<128x16xf32>
    %1 = arith.truncf %0 : vector<128x16xf32> to vector<128x16xbf16>
    %c0_1 = arith.constant 0 : index
    %c0_2 = arith.constant 0 : index
    %2 = vector.load %arg2[%c0_1, %c0_2] : memref<128x8xf32, #tpu.memory_space<vmem>>, vector<128x8xf32>
    %3 = arith.truncf %2 : vector<128x8xf32> to vector<128x8xbf16>
    %c0_3 = arith.constant 0 : index
    %c0_4 = arith.constant 0 : index
    %4 = vector.load %arg3[%c0_3, %c0_4] : memref<16x32xbf16, #tpu.memory_space<vmem>>, vector<16x32xbf16>
    %cst = arith.constant dense<0.000000e+00> : vector<128x32xf32>
    %5 = tpu.matmul %1, %4, %cst {dimension_numbers = #tpu.dot_dimension_numbers<[1], [0], [0], [1], [0, 0, 1, 1], [], []>} : vector<128x16xbf16>, vector<16x32xbf16>, vector<128x32xf32> -> vector<128x32xf32>
    %c0_5 = arith.constant 0 : index
    %c0_6 = arith.constant 0 : index
    %6 = vector.load %arg4[%c0_5, %c0_6] : memref<8x32xbf16, #tpu.memory_space<vmem>>, vector<8x32xbf16>
    %cst_7 = arith.constant dense<0.000000e+00> : vector<128x32xf32>
    %7 = tpu.matmul %3, %6, %cst_7 {dimension_numbers = #tpu.dot_dimension_numbers<[1], [0], [0], [1], [0, 0, 1, 1], [], []>} : vector<128x8xbf16>, vector<8x32xbf16>, vector<128x32xf32> -> vector<128x32xf32>
    %8 = arith.addf %5, %7 : vector<128x32xf32>
    %c0_8 = arith.constant 0 : index
    %c0_9 = arith.constant 0 : index
    %9 = vector.load %arg5[%c0_8, %c0_9] : memref<1x32xf32, #tpu.memory_space<vmem>>, vector<1x32xf32>
    %10 = vector.broadcast %9 : vector<1x32xf32> to vector<128x32xf32>
    %11 = arith.addf %8, %10 : vector<128x32xf32>
    %cst_10 = arith.constant 0.000000e+00 : f32
    %12 = vector.broadcast %cst_10 : f32 to vector<128x32xf32>
    %13 = arith.cmpf ogt, %11, %12 : vector<128x32xf32>
    %cst_11 = arith.constant 0.00999999977 : f32
    %14 = vector.broadcast %cst_11 : f32 to vector<128x32xf32>
    %15 = arith.mulf %14, %11 : vector<128x32xf32>
    %16 = arith.select %13, %11, %15 : vector<128x32xi1>, vector<128x32xf32>
    %17 = arith.truncf %16 : vector<128x32xf32> to vector<128x32xbf16>
    %c0_12 = arith.constant 0 : index
    %c0_13 = arith.constant 0 : index
    %18 = vector.load %arg6[%c0_12, %c0_13] : memref<32x32xbf16, #tpu.memory_space<vmem>>, vector<32x32xbf16>
    %cst_14 = arith.constant dense<0.000000e+00> : vector<128x32xf32>
    %19 = tpu.matmul %17, %18, %cst_14 {dimension_numbers = #tpu.dot_dimension_numbers<[1], [0], [0], [1], [0, 0, 1, 1], [], []>} : vector<128x32xbf16>, vector<32x32xbf16>, vector<128x32xf32> -> vector<128x32xf32>
    %c0_15 = arith.constant 0 : index
    %c0_16 = arith.constant 0 : index
    %20 = vector.load %arg7[%c0_15, %c0_16] : memref<1x32xf32, #tpu.memory_space<vmem>>, vector<1x32xf32>
    %21 = vector.broadcast %20 : vector<1x32xf32> to vector<128x32xf32>
    %22 = arith.addf %19, %21 : vector<128x32xf32>
    %cst_17 = arith.constant 0.000000e+00 : f32
    %23 = vector.broadcast %cst_17 : f32 to vector<128x32xf32>
    %24 = arith.cmpf ogt, %22, %23 : vector<128x32xf32>
    %cst_18 = arith.constant 0.00999999977 : f32
    %25 = vector.broadcast %cst_18 : f32 to vector<128x32xf32>
    %26 = arith.mulf %25, %22 : vector<128x32xf32>
    %27 = arith.select %24, %22, %26 : vector<128x32xi1>, vector<128x32xf32>
    %28 = arith.truncf %27 : vector<128x32xf32> to vector<128x32xbf16>
    %c0_19 = arith.constant 0 : index
    %c0_20 = arith.constant 0 : index
    %29 = vector.load %arg8[%c0_19, %c0_20] : memref<32x32xbf16, #tpu.memory_space<vmem>>, vector<32x32xbf16>
    %cst_21 = arith.constant dense<0.000000e+00> : vector<128x32xf32>
    %30 = tpu.matmul %28, %29, %cst_21 {dimension_numbers = #tpu.dot_dimension_numbers<[1], [0], [0], [1], [0, 0, 1, 1], [], []>} : vector<128x32xbf16>, vector<32x32xbf16>, vector<128x32xf32> -> vector<128x32xf32>
    %c0_22 = arith.constant 0 : index
    %c0_23 = arith.constant 0 : index
    %31 = vector.load %arg9[%c0_22, %c0_23] : memref<1x32xf32, #tpu.memory_space<vmem>>, vector<1x32xf32>
    %32 = vector.broadcast %31 : vector<1x32xf32> to vector<128x32xf32>
    %33 = arith.addf %30, %32 : vector<128x32xf32>
    %cst_24 = arith.constant 0.000000e+00 : f32
    %34 = vector.broadcast %cst_24 : f32 to vector<128x32xf32>
    %35 = arith.cmpf ogt, %33, %34 : vector<128x32xf32>
    %cst_25 = arith.constant 0.00999999977 : f32
    %36 = vector.broadcast %cst_25 : f32 to vector<128x32xf32>
    %37 = arith.mulf %36, %33 : vector<128x32xf32>
    %38 = arith.select %35, %33, %37 : vector<128x32xi1>, vector<128x32xf32>
    %c0_26 = arith.constant 0 : index
    %c0_27 = arith.constant 0 : index
    %39 = vector.load %arg10[%c0_26, %c0_27] : memref<1x32xbf16, #tpu.memory_space<vmem>>, vector<1x32xbf16>
    %40 = arith.truncf %38 : vector<128x32xf32> to vector<128x32xbf16>
    %cst_28 = arith.constant dense<0.000000e+00> : vector<1x128xf32>
    %41 = tpu.matmul %39, %40, %cst_28 {dimension_numbers = #tpu.dot_dimension_numbers<[1], [1], [0], [0], [0, 0, 1, 0], [], []>} : vector<1x32xbf16>, vector<128x32xbf16>, vector<1x128xf32> -> vector<1x128xf32>
    %c0_29 = arith.constant 0 : index
    %c0_30 = arith.constant 0 : index
    %42 = vector.load %arg11[%c0_29, %c0_30] : memref<1x1xf32, #tpu.memory_space<vmem>>, vector<1x1xf32>
    %43 = vector.broadcast %42 : vector<1x1xf32> to vector<1x128xf32>
    %44 = arith.addf %41, %43 : vector<1x128xf32>
    %c0_31 = arith.constant 0 : index
    %c0_32 = arith.constant 0 : index
    %45 = vector.load %arg12[%c0_31, %c0_32] : memref<1x128xf32, #tpu.memory_space<vmem>>, vector<1x128xf32>
    tpu.vector_store %arg12[%c0_31, %c0_32], %44 {strides = array<i32>} : memref<1x128xf32, #tpu.memory_space<vmem>>, vector<1x128xf32>,
    return
  }
  func.func @transform_0(%arg0: i32) -> (i32, i32) {
    %c0_i32 = arith.constant 0 : i32
    %c0_i32_0 = arith.constant 0 : i32
    return %arg0, %c0_i32 : i32, i32
  }
  func.func @transform_1(%arg0: i32) -> (i32, i32) {
    %c0_i32 = arith.constant 0 : i32
    %c0_i32_0 = arith.constant 0 : i32
    return %arg0, %c0_i32 : i32, i32
  }
  func.func @transform_2(%arg0: i32) -> (i32, i32) {
    %c0_i32 = arith.constant 0 : i32
    %c0_i32_0 = arith.constant 0 : i32
    %c0_i32_1 = arith.constant 0 : i32
    return %c0_i32, %c0_i32_0 : i32, i32
  }
  func.func @transform_3(%arg0: i32) -> (i32, i32) {
    %c0_i32 = arith.constant 0 : i32
    %c0_i32_0 = arith.constant 0 : i32
    %c0_i32_1 = arith.constant 0 : i32
    return %c0_i32, %c0_i32_0 : i32, i32
  }
  func.func @transform_4(%arg0: i32) -> (i32, i32) {
    %c0_i32 = arith.constant 0 : i32
    %c0_i32_0 = arith.constant 0 : i32
    %c0_i32_1 = arith.constant 0 : i32
    return %c0_i32, %c0_i32_0 : i32, i32
  }
  func.func @transform_5(%arg0: i32) -> (i32, i32) {
    %c0_i32 = arith.constant 0 : i32
    %c0_i32_0 = arith.constant 0 : i32
    %c0_i32_1 = arith.constant 0 : i32
    return %c0_i32, %c0_i32_0 : i32, i32
  }
  func.func @transform_6(%arg0: i32) -> (i32, i32) {
    %c0_i32 = arith.constant 0 : i32
    %c0_i32_0 = arith.constant 0 : i32
    %c0_i32_1 = arith.constant 0 : i32
    return %c0_i32, %c0_i32_0 : i32, i32
  }
  func.func @transform_7(%arg0: i32) -> (i32, i32) {
    %c0_i32 = arith.constant 0 : i32
    %c0_i32_0 = arith.constant 0 : i32
    %c0_i32_1 = arith.constant 0 : i32
    return %c0_i32, %c0_i32_0 : i32, i32
  }
  func.func @transform_8(%arg0: i32) -> (i32, i32) {
    %c0_i32 = arith.constant 0 : i32
    %c0_i32_0 = arith.constant 0 : i32
    %c0_i32_1 = arith.constant 0 : i32
    return %c0_i32, %c0_i32_0 : i32, i32
  }
  func.func @transform_9(%arg0: i32) -> (i32, i32) {
    %c0_i32 = arith.constant 0 : i32
    %c0_i32_0 = arith.constant 0 : i32
    %c0_i32_1 = arith.constant 0 : i32
    return %c0_i32, %c0_i32_0 : i32, i32
  }
  func.func @transform_10(%arg0: i32) -> (i32, i32) {
    %c0_i32 = arith.constant 0 : i32
    %c0_i32_0 = arith.constant 0 : i32
    %c0_i32_1 = arith.constant 0 : i32
    return %c0_i32, %c0_i32_0 : i32, i32
  }
  func.func @transform_11(%arg0: i32) -> (i32, i32) {
    %c0_i32 = arith.constant 0 : i32
    %c0_i32_0 = arith.constant 0 : i32
    return %c0_i32, %arg0 : i32, i32
  }
}

</mosaic_0001>

<bundles_post_ra>
// kernel: tpu_custom_call.1
= control target key start
LH: loop header
LB: loop body
LE: loop exit
PB: predicated region body
PF: predicated region fallthrough
CT: control target
= control target key end

     0   :  { %s1488_s0 = inlined_call_operand.vmem [shape: f32[128,16], index: 0, kind: input, shape index: {}]   ;;  %s1489_s1 = inlined_call_operand.vmem [shape: f32[128,8], index: 1, kind: input, shape index: {}]   ;;  %s1490_s2 = inlined_call_operand.vmem [shape: bf16[16,32], index: 2, kind: input, shape index: {}]   ;;  %s1491_s3 = inlined_call_operand.vmem [shape: bf16[8,32], index: 3, kind: input, shape index: {}]   ;;  %s1492_s4 = inlined_call_operand.vmem [shape: f32[1,32], index: 4, kind: input, shape index: {}]   ;;  %s1493_s5 = inlined_call_operand.vmem [shape: bf16[32,32], index: 5, kind: input, shape index: {}]   ;;  %s1494_s6 = inlined_call_operand.vmem [shape: f32[1,32], index: 6, kind: input, shape index: {}]   ;;  %s1495_s7 = inlined_call_operand.vmem [shape: bf16[32,32], index: 7, kind: input, shape index: {}]   ;;  %s1496_s8 = inlined_call_operand.vmem [shape: f32[1,32], index: 8, kind: input, shape index: {}]   ;;  %s1497_s9 = inlined_call_operand.vmem [shape: bf16[1,32], index: 9, kind: input, shape index: {}]   ;;  %s1498_s10 = inlined_call_operand.<no memory space> [shape: f32[1,1], index: 10, kind: input, shape index: {}]   ;;  %s1499_s11 = inlined_call_operand.hbm [shape: f32[1,128], index: 11, kind: output, shape index: {}]  }
   0x1   :  { %v16_v0 = vstv %s1498_s10 }
   0x2   :  { %17 = vst [vmem:[#allocation2] sm:$0x1] %v16_v0 }
   0x3   :  { %v92_v1 = vld [vmem:[%s1491_s3] sm:$0xf]  ;;  %vm118_vm0 = vcmask 1043456   ;;  %v67_v3 = vld [vmem:[%s1489_s1 + $0x8] sm:$0xff]  ;;  %vm93_vm1 = vcmask 64512   ;;  %v68_v6 = vld [vmem:[%s1489_s1 + $0x10] sm:$0xff] }
   0x4   :  { %v66_v2 = vld [vmem:[%s1489_s1] sm:$0xff]  ;;  %1122 = vmatprep.subr.msk.bf16.mxu0 %vm118_vm0, %v92_v1  ;;  %v120_v4 = vsel %vm118_vm0, %v92_v1, 0  ;;  %v69_v7 = vld [vmem:[%s1489_s1 + $0x18] sm:$0xff]  ;;  %1123 = vmatprep.subr.msk.bf16.mxu1 %vm118_vm0, %v92_v1  ;;  %v43_v11 = vld [vmem:[%s1488_s0 + $0x8] sm:$0xff]  ;;  %vm225_vm2 = vcmask 130048  }
   0x5   :  { %v82_v5 = vpack.c.bf16 %v67_v3, %v66_v2  ;;  %1009 = vmatpush3.bf16.msra.mxu0 %v120_v4  ;;  %v83_v8 = vpack.c.bf16 %v69_v7, %v68_v6  ;;  %v1129_v9 = vld [vmem:[%s1490_s2] sm:$0xff]   ;;  %1105 = vmatpush3.bf16.msra.mxu1 %v120_v4  ;;  %v71_v14 = vld [vmem:[%s1489_s1 + $0x28] sm:$0xff]  ;;  %v72_v16 = vld [vmem:[%s1489_s1 + $0x30] sm:$0xff] }
   0x6   :  { %v42_v10 = vld [vmem:[%s1488_s0] sm:$0xff]  ;;  %1026 = vmatprep.subr.bf16.mxu0 %v1129_v9  ;;  %v73_v17 = vld [vmem:[%s1489_s1 + $0x38] sm:$0xff]  ;;  %v75_v20 = vld [vmem:[%s1489_s1 + $0x48] sm:$0xff] }
   0x7   :  { %1010 = vmatprep.mubr.msk.bf16.mxu0 %vm93_vm1, %v82_v5  ;;  %v58_v12 = vpack.c.bf16 %v43_v11, %v42_v10  ;;  %v70_v13 = vld [vmem:[%s1489_s1 + $0x20] sm:$0xff]  ;;  %v85_v18 = vpack.c.bf16 %v73_v17, %v72_v16  ;;  %v44_v22 = vld [vmem:[%s1488_s0 + $0x10] sm:$0xff]  ;;  %v77_v24 = vld [vmem:[%s1489_s1 + $0x58] sm:$0xff] }
   0x8   :  { %1011 = vmatmul.mubr.msk.bf16.vlgmr.msra.gmra.mrb[0].mxu0 %vm93_vm1, %v83_v8  ;;  %v84_v15 = vpack.c.bf16 %v71_v14, %v70_v13  ;;  %v74_v19 = vld [vmem:[%s1489_s1 + $0x40] sm:$0xff]  ;;  %v76_v23 = vld [vmem:[%s1489_s1 + $0x50] sm:$0xff]  ;;  %v45_v25 = vld [vmem:[%s1488_s0 + $0x18] sm:$0xff] }
   0x9   :  { %1027 = vmatpush3.bf16.msra.mxu0 %v1129_v9  ;;  %1028 = vmatprep.mubr.msk.bf16.mxu0 %vm225_vm2, %v58_v12  ;;  %v86_v21 = vpack.c.bf16 %v75_v20, %v74_v19  ;;  %v78_v26 = vld [vmem:[%s1489_s1 + $0x60] sm:$0xff]  ;;  %v79_v27 = vld [vmem:[%s1489_s1 + $0x68] sm:$0xff]  ;;  %v87_v30 = vpack.c.bf16 %v77_v24, %v76_v23  ;;  %v59_v32 = vpack.c.bf16 %v45_v25, %v44_v22 }
   0xa   :  { %1014 = vmatprep.mubr.msk.bf16.mxu1 %vm93_vm1, %v84_v15  ;;  %v46_v28 = vld [vmem:[%s1488_s0 + $0x20] sm:$0xff]  ;;  %v47_v29 = vld [vmem:[%s1488_s0 + $0x28] sm:$0xff]  ;;  %v88_v33 = vpack.c.bf16 %v79_v27, %v78_v26 }
   0xb   :  { %1015 = vmatmul.mubr.msk.bf16.vlgmr.msra.gmra.mrb[0].mxu1 %vm93_vm1, %v85_v18  ;;  %v1130_v31 = vld [vmem:[%s1493_s5] sm:$0xff]   ;;  %v60_v34 = vpack.c.bf16 %v47_v29, %v46_v28 }
   0xc   :  { %1018 = vmatprep.mubr.msk.bf16.mxu1 %vm93_vm1, %v86_v21  ;;  %1044 = vmatprep.subr.bf16.mxu1 %v1130_v31 }
   0xd   :  { %1045 = vmatpush3.bf16.msra.mxu1 %v1130_v31 }
   0xe   :  { %18 = vsyncpa [#allocation4], 0  ;;  %v80_v35 = vld [vmem:[%s1489_s1 + $0x70] sm:$0xff]  ;;  %v81_v36 = vld [vmem:[%s1489_s1 + $0x78] sm:$0xff]  ;;  %vm449_vm7 = vcmask 261120   ;;  %s1161_s28 = smov [#allocation3]  }
   0xf   :  { %v48_v37 = vld [vmem:[%s1488_s0 + $0x30] sm:$0xff]  ;;  %v49_v38 = vld [vmem:[%s1488_s0 + $0x38] sm:$0xff]  ;;  %v50_v39 = vld [vmem:[%s1488_s0 + $0x40] sm:$0xff]  ;;  %v89_v41 = vpack.c.bf16 %v81_v36, %v80_v35  ;;  %s912_s29 = sshll.u32 %s1161_s28, 4  ;;  %s913_s29 = int_to_ptr.vmem [resolvable:$true] %s912_s29 }
  0x10   :  { %v51_v40 = vld [vmem:[%s1488_s0 + $0x48] sm:$0xff]  ;;  %v61_v42 = vpack.c.bf16 %v49_v38, %v48_v37  ;;  %v52_v44 = vld [vmem:[%s1488_s0 + $0x50] sm:$0xff]  ;;  %v53_v45 = vld [vmem:[%s1488_s0 + $0x58] sm:$0xff]  ;;  %s1134_s30 = scalar_lea.vmem %s913_s29, 16  ;;  %s1138_s1 = scalar_lea.vmem %s913_s29, 32 }
  0x11   :  { %v62_v43 = vpack.c.bf16 %v51_v40, %v50_v39  ;;  %v54_v46 = vld [vmem:[%s1488_s0 + $0x60] sm:$0xff]  ;;  %v55_v47 = vld [vmem:[%s1488_s0 + $0x68] sm:$0xff]  ;;  %v63_v48 = vpack.c.bf16 %v53_v45, %v52_v44  ;;  %v56_v50 = vld [vmem:[%s1488_s0 + $0x70] sm:$0xff]  ;;  %p1135_p0 = scmp.ne.s32.totalorder %s913_s29, %s1134_s30  ;;  %p1139_p1 = scmp.lt.s32.totalorder %s913_s29, %s913_s29 }
  0x12   :  { %v64_v49 = vpack.c.bf16 %v55_v47, %v54_v46  ;;  %v57_v51 = vld [vmem:[%s1488_s0 + $0x78] sm:$0xff]  ;;  %v1131_v53 = vld [vmem:[%s1493_s5 + $0x8] sm:$0xff]   ;;  %v1132_v54 = vld [vmem:[%s1495_s7] sm:$0xff]   ;;  %p1140_p2 = scmp.lt.s32.totalorder %s1138_s1, %s1134_s30 }
  0x13   :  { %1019 = vmatmul.mubr.msk.bf16.gmra.mrb[4].mxu1 %vm93_vm1, %v87_v30  ;;  %v65_v52 = vpack.c.bf16 %v57_v51, %v56_v50  ;;  %1046 = vmatprep.subr.bf16.mxu1 %v1131_v53  ;;  %v1355_v59 = vld [vmem:[%s1492_s4] ss:$0 sm:$0xff]  ;;  %v1133_v27 = vld [vmem:[%s1495_s7 + $0x8] sm:$0xff]  }
  0x14   :  { %1029 = vmatmul.mubr.msk.bf16.vlgmr.msra.gmra.mrb[0].mxu0 %vm225_vm2, %v59_v32  ;;  %1022 = vmatprep.mubr.msk.bf16.mxu1 %vm93_vm1, %v88_v33  ;;  %p1141_p3 = por %p1140_p2, %p1139_p1 }
  0x15   :  { %1032 = vmatprep.mubr.msk.bf16.mxu0 %vm225_vm2, %v60_v34  ;;  %1047 = vmatpush3.bf16.msra.mxu1 %v1131_v53 }
  0x16   :  { %1064 = vmatprep.subr.bf16.mxu1 %v1132_v54  ;;  %p1142_p4 = pnand %p1141_p3, %p1135_p0 }
  0x1b   :  { %1023 = vmatmul.mubr.msk.bf16.gmra.mrb[8].mxu1 %vm93_vm1, %v89_v41 }
  0x1c   :  { %1033 = vmatmul.mubr.msk.bf16.gmra.mrb[4].mxu0 %vm225_vm2, %v61_v42 }
  0x1d   :  { %1036 = vmatprep.mubr.msk.bf16.mxu0 %vm225_vm2, %v62_v43 }
  0x24   :  { %1037 = vmatmul.mubr.msk.bf16.gmra.mrb[8].mxu0 %vm225_vm2, %v63_v48 }
  0x25   :  { %1040 = vmatprep.mubr.msk.bf16.mxu0 %vm225_vm2, %v64_v49 }
  0x2c   :  { %1041 = vmatmul.mubr.msk.bf16.gmra.mrb[12].mxu0 %vm225_vm2, %v65_v52 }
  0xde   :  { %v1016_v55 = vpop.f32.mrb[0].mxu1 }
  0xdf   :  { %v172_v56 = vpop.f32.mrb[1].mxu1 }
  0xe0   :  { %v1017_v57 = vpop.f32.mrb[2].mxu1 }
  0xe1   :  { %v175_v58 = vpop.f32.mrb[3].mxu1 }
  0xe6   :  { %v1020_v60 = vpop.f32.mrb[4].mxu1 }
  0xe7   :  { %v1030_v61 = vpop.f32.mrb[0].mxu0  ;;  %v1357_v62 = vpop.f32.mrb[5].mxu1 }
  0xe8   :  { %v356_v63 = vadd.f32 %v1030_v61, %v1355_v59  ;;  %v284_v0 = vpop.f32.mrb[1].mxu0  ;;  %v1360_v1 = vpop.f32.mrb[6].mxu1 }
  0xe9   :  { %v354_v2 = vadd.f32 %v1355_v59, %v284_v0  ;;  %v1031_v3 = vpop.f32.mrb[2].mxu0  ;;  %v1363_v4 = vpop.f32.mrb[7].mxu1 }
  0xea   :  { %v388_v5 = vmul.f32 0.01, %v356_v63  ;;  %v357_v6 = vadd.f32 %v1031_v3, %v1355_v59  ;;  %v287_v7 = vpop.f32.mrb[3].mxu0  ;;  %vm372_vm3 = vcmp.gt.f32.partialorder %v356_v63, 0.0 }
  0xeb   :  { %v386_v8 = vmul.f32 0.01, %v354_v2  ;;  %v355_v9 = vadd.f32 %v1355_v59, %v287_v7  ;;  %vm370_vm4 = vcmp.gt.f32.partialorder %v354_v2, 0.0 }
  0xec   :  { %vm373_vm5 = vcmp.gt.f32.partialorder %v357_v6, 0.0  ;;  %v389_v10 = vmul.f32 0.01, %v357_v6  ;;  %v404_v12 = vsel %vm372_vm3, %v356_v63, %v388_v5 }
  0xed   :  { %vm371_vm6 = vcmp.gt.f32.partialorder %v355_v9, 0.0  ;;  %v387_v11 = vmul.f32 0.01, %v355_v9  ;;  %v402_v15 = vsel %vm370_vm4, %v354_v2, %v386_v8 }
  0xee   :  { %v405_v13 = vsel %vm373_vm5, %v357_v6, %v389_v10  ;;  %v1367_v14 = vpop.f32.mrb[8].mxu1 }
  0xef   :  { %v419_v16 = vpack.c.bf16 %v405_v13, %v404_v12  ;;  %v403_v17 = vsel %vm371_vm6, %v355_v9, %v387_v11  ;;  %v1034_v18 = vpop.f32.mrb[4].mxu0  ;;  %v1369_v19 = vpop.f32.mrb[9].mxu1 }
  0xf0   :  { %v418_v20 = vpack.c.bf16 %v403_v17, %v402_v15  ;;  %v309_v21 = vadd.f32 %v1034_v18, %v1016_v55  ;;  %v300_v22 = vpop.f32.mrb[5].mxu0  ;;  %v1371_v23 = vpop.f32.mrb[10].mxu1 }
  0xf1   :  { %v301_v24 = vadd.f32 %v300_v22, %v172_v56  ;;  %v1035_v25 = vpop.f32.mrb[6].mxu0  ;;  %v1373_v26 = vpop.f32.mrb[11].mxu1 }
  0xf2   :  { %v360_v28 = vadd.f32 %v1355_v59, %v309_v21  ;;  %v312_v29 = vadd.f32 %v1035_v25, %v1017_v57  ;;  %v303_v30 = vpop.f32.mrb[7].mxu0  ;;  %1048 = vmatprep.mubr.msk.bf16.mxu1 %vm449_vm7, %v418_v20 }
  0xf3   :  { %v358_v31 = vadd.f32 %v1355_v59, %v301_v24  ;;  %v304_v32 = vadd.f32 %v303_v30, %v175_v58  ;;  %1049 = vmatmul.mubr.msk.bf16.vlgmr.msra.gmra.mrb[12].mxu1 %vm449_vm7, %v419_v16 }
  0xf4   :  { %vm376_vm8 = vcmp.gt.f32.partialorder %v360_v28, 0.0  ;;  %v392_v33 = vmul.f32 0.01, %v360_v28  ;;  %v361_v34 = vadd.f32 %v1355_v59, %v312_v29  ;;  %1065 = vmatpush3.bf16.msra.mxu1 %v1132_v54 }
  0xf5   :  { %vm374_vm9 = vcmp.gt.f32.partialorder %v358_v31, 0.0  ;;  %v390_v35 = vmul.f32 0.01, %v358_v31  ;;  %v359_v36 = vadd.f32 %v1355_v59, %v304_v32  ;;  %1066 = vmatprep.subr.bf16.mxu1 %v1133_v27 }
  0xf6   :  { %v408_v37 = vsel %vm376_vm8, %v360_v28, %v392_v33  ;;  %vm377_vm10 = vcmp.gt.f32.partialorder %v361_v34, 0.0  ;;  %v393_v38 = vmul.f32 0.01, %v361_v34 }
  0xf7   :  { %v406_v39 = vsel %vm374_vm9, %v358_v31, %v390_v35  ;;  %vm375_vm11 = vcmp.gt.f32.partialorder %v359_v36, 0.0  ;;  %v391_v40 = vmul.f32 0.01, %v359_v36  ;;  %v1038_v41 = vpop.f32.mrb[8].mxu0 }
  0xf8   :  { %v409_v42 = vsel %vm377_vm10, %v361_v34, %v393_v38  ;;  %v325_v43 = vadd.f32 %v1038_v41, %v1020_v60  ;;  %v316_v44 = vpop.f32.mrb[9].mxu0  ;;  %1067 = vmatpush3.bf16.msra.mxu1 %v1133_v27 }
  0xf9   :  { %v407_v45 = vsel %vm375_vm11, %v359_v36, %v391_v40  ;;  %v317_v46 = vadd.f32 %v316_v44, %v1357_v62  ;;  %v1039_v47 = vpop.f32.mrb[10].mxu0  ;;  %v421_v48 = vpack.c.bf16 %v409_v42, %v408_v37 }
  0xfa   :  { %v364_v49 = vadd.f32 %v1355_v59, %v325_v43  ;;  %v328_v50 = vadd.f32 %v1039_v47, %v1360_v1  ;;  %v319_v51 = vpop.f32.mrb[11].mxu0  ;;  %v420_v52 = vpack.c.bf16 %v407_v45, %v406_v39 }
  0xfb   :  { %v362_v53 = vadd.f32 %v1355_v59, %v317_v46  ;;  %v320_v54 = vadd.f32 %v319_v51, %v1363_v4 }
  0xfc   :  { %vm380_vm12 = vcmp.gt.f32.partialorder %v364_v49, 0.0  ;;  %v396_v55 = vmul.f32 0.01, %v364_v49  ;;  %v365_v56 = vadd.f32 %v1355_v59, %v328_v50  ;;  %1052 = vmatprep.mubr.msk.bf16.mxu1 %vm449_vm7, %v420_v52 }
  0xfd   :  { %vm378_vm13 = vcmp.gt.f32.partialorder %v362_v53, 0.0  ;;  %v394_v57 = vmul.f32 0.01, %v362_v53  ;;  %v363_v58 = vadd.f32 %v1355_v59, %v320_v54  ;;  %1053 = vmatmul.mubr.msk.bf16.gmra.mrb[16].mxu1 %vm449_vm7, %v421_v48 }
  0xfe   :  { %v412_v60 = vsel %vm380_vm12, %v364_v49, %v396_v55  ;;  %vm381_vm14 = vcmp.gt.f32.partialorder %v365_v56, 0.0  ;;  %v397_v61 = vmul.f32 0.01, %v365_v56 }
  0xff   :  { %v410_v62 = vsel %vm378_vm13, %v362_v53, %v394_v57  ;;  %vm379_vm15 = vcmp.gt.f32.partialorder %v363_v58, 0.0  ;;  %v395_v63 = vmul.f32 0.01, %v363_v58  ;;  %v1042_v0 = vpop.f32.mrb[12].mxu0 }
 0x100   :  { %v413_v1 = vsel %vm381_vm14, %v365_v56, %v397_v61  ;;  %v341_v2 = vadd.f32 %v1042_v0, %v1367_v14  ;;  %v332_v3 = vpop.f32.mrb[13].mxu0 }
 0x101   :  { %v411_v4 = vsel %vm379_vm15, %v363_v58, %v395_v63  ;;  %v423_v5 = vpack.c.bf16 %v413_v1, %v412_v60  ;;  %v333_v6 = vadd.f32 %v332_v3, %v1369_v19  ;;  %v1043_v7 = vpop.f32.mrb[14].mxu0 }
 0x102   :  { %v422_v8 = vpack.c.bf16 %v411_v4, %v410_v62  ;;  %v368_v9 = vadd.f32 %v1355_v59, %v341_v2  ;;  %v344_v10 = vadd.f32 %v1043_v7, %v1371_v23  ;;  %v335_v11 = vpop.f32.mrb[15].mxu0 }
 0x103   :  { %v366_v12 = vadd.f32 %v1355_v59, %v333_v6  ;;  %v336_v13 = vadd.f32 %v335_v11, %v1373_v26  ;;  %v1408_v26 = vld [vmem:[%s1494_s6] ss:$0 sm:$0xff] }
 0x104   :  { %1056 = vmatprep.mubr.msk.bf16.mxu1 %vm449_vm7, %v422_v8  ;;  %vm384_vm0 = vcmp.gt.f32.partialorder %v368_v9, 0.0  ;;  %v400_v14 = vmul.f32 0.01, %v368_v9  ;;  %v369_v15 = vadd.f32 %v1355_v59, %v344_v10 }
 0x105   :  { %1057 = vmatmul.mubr.msk.bf16.gmra.mrb[20].mxu1 %vm449_vm7, %v423_v5  ;;  %vm382_vm1 = vcmp.gt.f32.partialorder %v366_v12, 0.0  ;;  %v398_v16 = vmul.f32 0.01, %v366_v12  ;;  %v367_v17 = vadd.f32 %v1355_v59, %v336_v13 }
 0x106   :  { %v416_v18 = vsel %vm384_vm0, %v368_v9, %v400_v14  ;;  %vm385_vm2 = vcmp.gt.f32.partialorder %v369_v15, 0.0  ;;  %v401_v19 = vmul.f32 0.01, %v369_v15 }
 0x107   :  { %v414_v20 = vsel %vm382_vm1, %v366_v12, %v398_v16  ;;  %vm383_vm3 = vcmp.gt.f32.partialorder %v367_v17, 0.0  ;;  %v399_v21 = vmul.f32 0.01, %v367_v17 }
 0x108   :  { %v417_v22 = vsel %vm385_vm2, %v369_v15, %v401_v19 }
 0x109   :  { %v415_v23 = vsel %vm383_vm3, %v367_v17, %v399_v21  ;;  %v425_v24 = vpack.c.bf16 %v417_v22, %v416_v18 }
 0x10a   :  { %v424_v25 = vpack.c.bf16 %v415_v23, %v414_v20 }
 0x10c   :  { %1060 = vmatprep.mubr.msk.bf16.mxu1 %vm449_vm7, %v424_v25 }
 0x10d   :  { %1061 = vmatmul.mubr.msk.bf16.gmra.mrb[24].mxu1 %vm449_vm7, %v425_v24 }
 0x1c6   :  { %v1050_v59 = vpop.f32.mrb[12].mxu1 }
 0x1c7   :  { %v517_v27 = vadd.f32 %v1050_v59, %v1408_v26  ;;  %v508_v28 = vpop.f32.mrb[13].mxu1 }
 0x1c8   :  { %v509_v29 = vadd.f32 %v1408_v26, %v508_v28  ;;  %v1051_v30 = vpop.f32.mrb[14].mxu1 }
 0x1c9   :  { %v589_v31 = vmul.f32 0.01, %v517_v27  ;;  %v520_v32 = vadd.f32 %v1051_v30, %v1408_v26  ;;  %v511_v33 = vpop.f32.mrb[15].mxu1  ;;  %vm573_vm4 = vcmp.gt.f32.partialorder %v517_v27, 0.0 }
 0x1ca   :  { %v587_v34 = vmul.f32 0.01, %v509_v29  ;;  %v512_v35 = vadd.f32 %v1408_v26, %v511_v33  ;;  %vm571_vm5 = vcmp.gt.f32.partialorder %v509_v29, 0.0 }
 0x1cb   :  { %vm574_vm6 = vcmp.gt.f32.partialorder %v520_v32, 0.0  ;;  %v590_v36 = vmul.f32 0.01, %v520_v32  ;;  %v605_v38 = vsel %vm573_vm4, %v517_v27, %v589_v31 }
 0x1cc   :  { %vm572_vm8 = vcmp.gt.f32.partialorder %v512_v35, 0.0  ;;  %v588_v37 = vmul.f32 0.01, %v512_v35  ;;  %v603_v40 = vsel %vm571_vm5, %v509_v29, %v587_v34  ;;  %vm1159_vm5 = vmmov 0  }
 0x1cd   :  { %v606_v39 = vsel %vm574_vm6, %v520_v32, %v590_v36  ;;  %v1160_v36 = vmov 0  }
 0x1ce   :  { %v620_v41 = vpack.c.bf16 %v606_v39, %v605_v38  ;;  %v604_v42 = vsel %vm572_vm8, %v512_v35, %v588_v37  ;;  %v1158_v35 = vmov 0.0   ;;  %1128 = vset.pattern.permute.xlu0 %v1160_v36  ;;  %v1439_v37 = vld [vmem:[%s1496_s8] ss:$0 sm:$0xff] }
 0x1cf   :  { %v619_v43 = vpack.c.bf16 %v604_v42, %v603_v40  ;;  %1084 = vmatprep.subr.bf16.mxu0 %v1158_v35  ;;  %1100 = vmatprep.mubr.msk.bf16.mxu0 %vm1159_vm5, %v1158_v35 }
 0x1d0   :  { %v1054_v44 = vpop.f32.mrb[16].mxu1 }
 0x1d1   :  { %v533_v45 = vadd.f32 %v1054_v44, %v1408_v26  ;;  %v524_v46 = vpop.f32.mrb[17].mxu1  ;;  %1068 = vmatprep.mubr.msk.bf16.mxu1 %vm449_vm7, %v619_v43 }
 0x1d2   :  { %v525_v47 = vadd.f32 %v1408_v26, %v524_v46  ;;  %v1055_v48 = vpop.f32.mrb[18].mxu1  ;;  %1069 = vmatmul.mubr.msk.bf16.vlgmr.msra.gmra.mrb[28].mxu1 %vm449_vm7, %v620_v41 }
 0x1d3   :  { %v593_v49 = vmul.f32 0.01, %v533_v45  ;;  %v536_v50 = vadd.f32 %v1055_v48, %v1408_v26  ;;  %v527_v51 = vpop.f32.mrb[19].mxu1  ;;  %vm577_vm9 = vcmp.gt.f32.partialorder %v533_v45, 0.0 }
 0x1d4   :  { %v591_v52 = vmul.f32 0.01, %v525_v47  ;;  %v528_v53 = vadd.f32 %v1408_v26, %v527_v51  ;;  %vm575_vm10 = vcmp.gt.f32.partialorder %v525_v47, 0.0 }
 0x1d5   :  { %vm578_vm11 = vcmp.gt.f32.partialorder %v536_v50, 0.0  ;;  %v594_v54 = vmul.f32 0.01, %v536_v50  ;;  %v609_v56 = vsel %vm577_vm9, %v533_v45, %v593_v49 }
 0x1d6   :  { %vm576_vm12 = vcmp.gt.f32.partialorder %v528_v53, 0.0  ;;  %v592_v55 = vmul.f32 0.01, %v528_v53  ;;  %v607_v58 = vsel %vm575_vm10, %v525_v47, %v591_v52 }
 0x1d7   :  { %v610_v57 = vsel %vm578_vm11, %v536_v50, %v594_v54 }
 0x1d8   :  { %v622_v60 = vpack.c.bf16 %v610_v57, %v609_v56  ;;  %v608_v61 = vsel %vm576_vm12, %v528_v53, %v592_v55  ;;  %v1058_v62 = vpop.f32.mrb[20].mxu1 }
 0x1d9   :  { %v621_v63 = vpack.c.bf16 %v608_v61, %v607_v58  ;;  %v549_v0 = vadd.f32 %v1058_v62, %v1408_v26  ;;  %v540_v1 = vpop.f32.mrb[21].mxu1 }
 0x1da   :  { %v541_v2 = vadd.f32 %v1408_v26, %v540_v1  ;;  %v1059_v3 = vpop.f32.mrb[22].mxu1 }
 0x1db   :  { %vm581_vm13 = vcmp.gt.f32.partialorder %v549_v0, 0.0  ;;  %v597_v4 = vmul.f32 0.01, %v549_v0  ;;  %v552_v5 = vadd.f32 %v1059_v3, %v1408_v26  ;;  %v543_v6 = vpop.f32.mrb[23].mxu1  ;;  %1072 = vmatprep.mubr.msk.bf16.mxu1 %vm449_vm7, %v621_v63 }
 0x1dc   :  { %vm579_vm14 = vcmp.gt.f32.partialorder %v541_v2, 0.0  ;;  %v595_v7 = vmul.f32 0.01, %v541_v2  ;;  %v544_v8 = vadd.f32 %v1408_v26, %v543_v6  ;;  %1073 = vmatmul.mubr.msk.bf16.gmra.mrb[32].mxu1 %vm449_vm7, %v622_v60 }
 0x1dd   :  { %v613_v9 = vsel %vm581_vm13, %v549_v0, %v597_v4  ;;  %vm582_vm15 = vcmp.gt.f32.partialorder %v552_v5, 0.0  ;;  %v598_v10 = vmul.f32 0.01, %v552_v5 }
 0x1de   :  { %v611_v11 = vsel %vm579_vm14, %v541_v2, %v595_v7  ;;  %vm580_vm0 = vcmp.gt.f32.partialorder %v544_v8, 0.0  ;;  %v596_v12 = vmul.f32 0.01, %v544_v8 }
 0x1df   :  { %v614_v13 = vsel %vm582_vm15, %v552_v5, %v598_v10 }
 0x1e0   :  { %v624_v14 = vpack.c.bf16 %v614_v13, %v613_v9  ;;  %v612_v15 = vsel %vm580_vm0, %v544_v8, %v596_v12  ;;  %v1062_v16 = vpop.f32.mrb[24].mxu1 }
 0x1e1   :  { %v623_v17 = vpack.c.bf16 %v612_v15, %v611_v11  ;;  %v565_v18 = vadd.f32 %v1062_v16, %v1408_v26  ;;  %v556_v19 = vpop.f32.mrb[25].mxu1 }
 0x1e2   :  { %v557_v20 = vadd.f32 %v1408_v26, %v556_v19  ;;  %v1063_v21 = vpop.f32.mrb[26].mxu1 }
 0x1e3   :  { %1076 = vmatprep.mubr.msk.bf16.mxu1 %vm449_vm7, %v623_v17  ;;  %vm585_vm1 = vcmp.gt.f32.partialorder %v565_v18, 0.0  ;;  %v601_v22 = vmul.f32 0.01, %v565_v18  ;;  %v568_v23 = vadd.f32 %v1063_v21, %v1408_v26  ;;  %v559_v24 = vpop.f32.mrb[27].mxu1 }
 0x1e4   :  { %1077 = vmatmul.mubr.msk.bf16.gmra.mrb[36].mxu1 %vm449_vm7, %v624_v14  ;;  %vm583_vm2 = vcmp.gt.f32.partialorder %v557_v20, 0.0  ;;  %v599_v25 = vmul.f32 0.01, %v557_v20  ;;  %v560_v59 = vadd.f32 %v1408_v26, %v559_v24  ;;  %v828_v26 = vld [vmem:[#allocation2] sm:$0x1] }
 0x1e5   :  { %v617_v27 = vsel %vm585_vm1, %v565_v18, %v601_v22  ;;  %vm586_vm3 = vcmp.gt.f32.partialorder %v568_v23, 0.0  ;;  %v602_v28 = vmul.f32 0.01, %v568_v23  ;;  %831 = vperm.xlu0 %1128, %v828_v26  }
 0x1e6   :  { %v615_v29 = vsel %vm583_vm2, %v557_v20, %v599_v25  ;;  %vm584_vm4 = vcmp.gt.f32.partialorder %v560_v59, 0.0  ;;  %v600_v30 = vmul.f32 0.01, %v560_v59 }
 0x1e7   :  { %v618_v31 = vsel %vm586_vm3, %v568_v23, %v602_v28 }
 0x1e8   :  { %v626_v32 = vpack.c.bf16 %v618_v31, %v617_v27  ;;  %v616_v33 = vsel %vm584_vm4, %v560_v59, %v600_v30 }
 0x1e9   :  { %v625_v34 = vpack.c.bf16 %v616_v33, %v615_v29 }
 0x1eb   :  { %1080 = vmatprep.mubr.msk.bf16.mxu1 %vm449_vm7, %v625_v34 }
 0x1ec   :  { %1081 = vmatmul.mubr.msk.bf16.gmra.mrb[40].mxu1 %vm449_vm7, %v626_v32 }
 0x2a5   :  { %v1070_v38 = vpop.f32.mrb[28].mxu1 }
 0x2a6   :  { %v717_v39 = vadd.f32 %v1070_v38, %v1439_v37  ;;  %v708_v40 = vpop.f32.mrb[29].mxu1 }
 0x2a7   :  { %v709_v41 = vadd.f32 %v1439_v37, %v708_v40  ;;  %v1071_v42 = vpop.f32.mrb[30].mxu1 }
 0x2a8   :  { %v789_v43 = vmul.f32 0.01, %v717_v39  ;;  %v720_v44 = vadd.f32 %v1071_v42, %v1439_v37  ;;  %v711_v45 = vpop.f32.mrb[31].mxu1  ;;  %vm773_vm6 = vcmp.gt.f32.partialorder %v717_v39, 0.0 }
 0x2a9   :  { %v787_v46 = vmul.f32 0.01, %v709_v41  ;;  %v712_v47 = vadd.f32 %v1439_v37, %v711_v45  ;;  %vm771_vm8 = vcmp.gt.f32.partialorder %v709_v41, 0.0 }
 0x2aa   :  { %vm774_vm9 = vcmp.gt.f32.partialorder %v720_v44, 0.0  ;;  %v790_v48 = vmul.f32 0.01, %v720_v44  ;;  %v805_v50 = vsel %vm773_vm6, %v717_v39, %v789_v43 }
 0x2ab   :  { %vm772_vm10 = vcmp.gt.f32.partialorder %v712_v47, 0.0  ;;  %v788_v49 = vmul.f32 0.01, %v712_v47  ;;  %v803_v52 = vsel %vm771_vm8, %v709_v41, %v787_v46 }
 0x2ac   :  { %v806_v51 = vsel %vm774_vm9, %v720_v44, %v790_v48 }
 0x2ad   :  { %v804_v53 = vsel %vm772_vm10, %v712_v47, %v788_v49  ;;  %v821_v54 = vpack.c.bf16 %v806_v51, %v805_v50 }
 0x2ae   :  { %v820_v55 = vpack.c.bf16 %v804_v53, %v803_v52 }
 0x2af   :  { %v1074_v56 = vpop.f32.mrb[32].mxu1  ;;  %v845_v14 = vsel %vm449_vm7, %v821_v54, 0 }
 0x2b0   :  { %v733_v57 = vadd.f32 %v1074_v56, %v1439_v37  ;;  %v724_v58 = vpop.f32.mrb[33].mxu1  ;;  %v842_v60 = vsel %vm449_vm7, %v820_v55, 0  ;;  %v819_v55 = vld [vmem:[%s1497_s9] sm:$0x1]  ;;  %v834_v56 = vlaneseq }
 0x2b1   :  { %v725_v61 = vadd.f32 %v1439_v37, %v724_v58  ;;  %v1075_v62 = vpop.f32.mrb[34].mxu1  ;;  %1085 = vmatpush3.bf16.xpose.msra.mxu0 %v842_v60  ;;  %v832_v60 = vpop.permute.xlu0 %831 }
 0x2b2   :  { %v793_v63 = vmul.f32 0.01, %v733_v57  ;;  %v736_v0 = vadd.f32 %v1075_v62, %v1439_v37  ;;  %v727_v1 = vpop.f32.mrb[35].mxu1  ;;  %1086 = vmatprep.subr.bf16.mxu0 %v1158_v35  ;;  %vm777_vm11 = vcmp.gt.f32.partialorder %v733_v57, 0.0 }
 0x2b3   :  { %v791_v2 = vmul.f32 0.01, %v725_v61  ;;  %v728_v3 = vadd.f32 %v1439_v37, %v727_v1  ;;  %vm775_vm12 = vcmp.gt.f32.partialorder %v725_v61, 0.0 }
 0x2b4   :  { %vm778_vm13 = vcmp.gt.f32.partialorder %v736_v0, 0.0  ;;  %v794_v4 = vmul.f32 0.01, %v736_v0  ;;  %v809_v6 = vsel %vm777_vm11, %v733_v57, %v793_v63  ;;  %v835_v57 = vshrl.u32 %v834_v56, 7 }
 0x2b5   :  { %vm776_vm14 = vcmp.gt.f32.partialorder %v728_v3, 0.0  ;;  %v792_v5 = vmul.f32 0.01, %v728_v3  ;;  %v807_v8 = vsel %vm775_vm12, %v725_v61, %v791_v2 }
 0x2b6   :  { %v810_v7 = vsel %vm778_vm13, %v736_v0, %v794_v4  ;;  %v836_v58 = vsub.s32 0, %v835_v57 }
 0x2b7   :  { %v808_v9 = vsel %vm776_vm14, %v728_v3, %v792_v5  ;;  %v1078_v10 = vpop.f32.mrb[36].mxu1  ;;  %v823_v11 = vpack.c.bf16 %v810_v7, %v809_v6 }
 0x2b8   :  { %v749_v12 = vadd.f32 %v1078_v10, %v1439_v37  ;;  %v740_v13 = vpop.f32.mrb[37].mxu1  ;;  %v822_v15 = vpack.c.bf16 %v808_v9, %v807_v8  ;;  %v837_v61 = vrot.slane %v832_v60, %v836_v58 }
 0x2b9   :  { %v741_v16 = vadd.f32 %v1439_v37, %v740_v13  ;;  %v1079_v17 = vpop.f32.mrb[38].mxu1  ;;  %1087 = vmatpush3.bf16.xpose.msra.mxu0 %v845_v14  ;;  %v851_v50 = vsel %vm449_vm7, %v823_v11, 0 }
 0x2ba   :  { %v797_v18 = vmul.f32 0.01, %v749_v12  ;;  %v752_v19 = vadd.f32 %v1079_v17, %v1439_v37  ;;  %v743_v20 = vpop.f32.mrb[39].mxu1  ;;  %1088 = vmatprep.subr.bf16.mxu0 %v1158_v35  ;;  %vm781_vm15 = vcmp.gt.f32.partialorder %v749_v12, 0.0  ;;  %v848_v31 = vsel %vm449_vm7, %v822_v15, 0 }
 0x2bb   :  { %v795_v21 = vmul.f32 0.01, %v741_v16  ;;  %v744_v22 = vadd.f32 %v1439_v37, %v743_v20  ;;  %vm779_vm0 = vcmp.gt.f32.partialorder %v741_v16, 0.0 }
 0x2bc   :  { %vm782_vm1 = vcmp.gt.f32.partialorder %v752_v19, 0.0  ;;  %v798_v23 = vmul.f32 0.01, %v752_v19  ;;  %v813_v25 = vsel %vm781_vm15, %v749_v12, %v797_v18 }
 0x2bd   :  { %vm780_vm2 = vcmp.gt.f32.partialorder %v744_v22, 0.0  ;;  %v796_v24 = vmul.f32 0.01, %v744_v22  ;;  %v811_v27 = vsel %vm779_vm0, %v741_v16, %v795_v21 }
 0x2be   :  { %v814_v59 = vsel %vm782_vm1, %v752_v19, %v798_v23 }
 0x2bf   :  { %v812_v28 = vsel %vm780_vm2, %v744_v22, %v796_v24  ;;  %v1082_v29 = vpop.f32.mrb[40].mxu1  ;;  %v825_v30 = vpack.c.bf16 %v814_v59, %v813_v25 }
 0x2c0   :  { %v765_v32 = vadd.f32 %v1082_v29, %v1439_v37  ;;  %v756_v33 = vpop.f32.mrb[41].mxu1  ;;  %v824_v34 = vpack.c.bf16 %v812_v28, %v811_v27 }
 0x2c1   :  { %1089 = vmatpush3.bf16.xpose.msra.mxu0 %v848_v31  ;;  %v757_v26 = vadd.f32 %v1439_v37, %v756_v33  ;;  %v1083_v36 = vpop.f32.mrb[42].mxu1 }
 0x2c2   :  { %vm785_vm3 = vcmp.gt.f32.partialorder %v765_v32, 0.0  ;;  %v801_v38 = vmul.f32 0.01, %v765_v32  ;;  %v768_v39 = vadd.f32 %v1083_v36, %v1439_v37  ;;  %v759_v40 = vpop.f32.mrb[43].mxu1  ;;  %1090 = vmatprep.subr.bf16.mxu0 %v1158_v35  ;;  %v854_v52 = vsel %vm449_vm7, %v824_v34, 0 }
 0x2c3   :  { %vm783_vm4 = vcmp.gt.f32.partialorder %v757_v26, 0.0  ;;  %v799_v41 = vmul.f32 0.01, %v757_v26  ;;  %v760_v42 = vadd.f32 %v1439_v37, %v759_v40  ;;  %v857_v37 = vsel %vm449_vm7, %v825_v30, 0 }
 0x2c4   :  { %v817_v43 = vsel %vm785_vm3, %v765_v32, %v801_v38  ;;  %vm786_vm5 = vcmp.gt.f32.partialorder %v768_v39, 0.0  ;;  %v802_v44 = vmul.f32 0.01, %v768_v39 }
 0x2c5   :  { %v815_v45 = vsel %vm783_vm4, %v757_v26, %v799_v41  ;;  %vm784_vm6 = vcmp.gt.f32.partialorder %v760_v42, 0.0  ;;  %v800_v46 = vmul.f32 0.01, %v760_v42 }
 0x2c6   :  { %v818_v47 = vsel %vm786_vm5, %v768_v39, %v802_v44 }
 0x2c7   :  { %v816_v48 = vsel %vm784_vm6, %v760_v42, %v800_v46  ;;  %v827_v49 = vpack.c.bf16 %v818_v47, %v817_v43 }
 0x2c8   :  { %v826_v51 = vpack.c.bf16 %v816_v48, %v815_v45 }
 0x2c9   :  { %1091 = vmatpush3.bf16.xpose.msra.mxu0 %v851_v50  ;;  %v863_v54 = vsel %vm449_vm7, %v827_v49, 0 }
 0x2ca   :  { %1092 = vmatprep.subr.bf16.mxu0 %v1158_v35  ;;  %v860_v53 = vsel %vm449_vm7, %v826_v51, 0 }
 0x2d1   :  { %1093 = vmatpush3.bf16.xpose.msra.mxu0 %v854_v52 }
 0x2d2   :  { %1094 = vmatprep.subr.bf16.mxu0 %v1158_v35 }
 0x2d9   :  { %1095 = vmatpush3.bf16.xpose.msra.mxu0 %v857_v37 }
 0x2da   :  { %1096 = vmatprep.subr.bf16.mxu0 %v1158_v35 }
 0x2e1   :  { %1097 = vmatpush3.bf16.xpose.msra.mxu0 %v860_v53 }
 0x2e2   :  { %1098 = vmatprep.subr.bf16.mxu0 %v1158_v35 }
 0x2e9   :  { %1099 = vmatpush3.bf16.xpose.msra.mxu0 %v863_v54 }
 0x2f0   :  { %1101 = vmatmul.mubr.msk.bf16.vlgmr.msra.gmra.mrb[16].mxu0 %vm449_vm7, %v819_v55 }
 0x3c3   :  { %v899_v62 = vpop.f32.mrb[16].mxu0 }
 0x3c4   :  { %v900_v63 = vadd.f32 %v899_v62, %v837_v61  ;;  %v1102_v0 = vpop.f32.mrb[17].mxu0 }
 0x3c5   :  { %v902_v35 = vpop.f32.mrb[18].mxu0 }
 0x3c6   :  { %905 = vst [vmem:[#allocation3] sm:$0x1] %v900_v63  ;;  %v1103_v1 = vpop.f32.mrb[19].mxu0 }
 0x3c7   :  { %1145 = shalt.err (!%p1142_p4)
}
 0x3c8   :  { %s1146_s13 = scalar_lea.hbm %s1499_s11, 16 }
 0x3c9   :  { %p1147_p5 = scmp.ne.s32.totalorder %s1499_s11, %s1146_s13  ;;  %p1150_p6 = scmp.lt.u32.totalorder %s1146_s13, %s1499_s11 }
 0x3cb   :  { %p1152_p7 = pnand %p1150_p6, %p1147_p5 }
 0x3cd   :  { %1155 = shalt.err (!%p1152_p7)
}
 0x3ce   :  { %915 = dma.vmem_to_hbm [thread:$0]  %s913_s29, 16, %s1499_s11, [#allocation4]  }
 0x3cf   :  { %1156 = dma.done.wait [#allocation4], 16  }
 0x3d0   :  { %1157 = vsyncadd [#allocation4], 4294967280 }
 0x3d1   :  { %919 = vsyncpa [#allocation4], 1 }

</bundles_post_ra>
